<compile_context>
chip_gen: v5e
topology: v5e:2x2
jax: 0.10.0
libtpu: 0.0.40
codegen_flags: <defaults>
</compile_context>

<pallas_src>
import functools

import jax
import jax.numpy as jnp
from jax import lax
from jax.experimental import pallas as pl
from jax.experimental.pallas import tpu as pltpu

EPS = 1e-5


def _fill_cat(cat_ref, act, nb, hh, lk):
    """Write activation rows (nb, hh, lk) into the K-concatenated scratch as three
    row-shifted dy slabs.  Vertical SAME padding = the two zeroed border strips;
    horizontal SAME padding lives entirely in the banded weights."""
    zrow = jnp.zeros((nb, 1, lk), jnp.float32)
    # dy = 0 slab: padded row i -> act row i-1 (row 0 is zero padding)
    cat_ref[:, 0:1, 0:lk] = zrow
    cat_ref[:, 1:hh, 0:lk] = act[:, 0:hh - 1, :]
    # dy = 1 slab: identity rows
    cat_ref[:, :, lk:2 * lk] = act
    # dy = 2 slab: padded row i -> act row i+1 (last row is zero padding)
    cat_ref[:, 0:hh - 1, 2 * lk:3 * lk] = act[:, 1:hh, :]
    cat_ref[:, hh - 1:hh, 2 * lk:3 * lk] = zrow


def _conv_in_relu(cat_ref, w_ref, bias_ref, g_ref, be_ref, r_ref, t_ref,
                  nb, hh, wh, cout, mm_dtype):
    """3x3 SAME conv (single fused MXU matmul) + bias + InstanceNorm + ReLU.

    cat_ref : (nb, hh, 3*wh*ci)   row-shifted activation slabs (dy folded into K)
    w_ref   : (3*wh*ci, wh*cout)  fused banded weight (dy and dx folded into K / N)
    bias_ref: (1, wh*cout)        row-tiled conv bias
    g_ref   : (1, cout)           InstanceNorm gamma
    be_ref  : (1, cout)           InstanceNorm beta
    r_ref   : (wh*cout, cout)     channel-sum selector,   r[j*cout+o, o'] = (o == o')
    t_ref   : (cout, wh*cout)     lane-broadcast selector (r transposed)
    returns : (nb, hh, wh*cout) float32
    """
    k = cat_ref.shape[2]                        # 3*wh*ci
    wo = wh * cout

    # --- conv: one MXU matmul, all 9 taps folded into (K, N) of the banded weight.
    rows = cat_ref[...].reshape(nb * hh, k)     # leading-dim merge only
    acc = jnp.dot(rows.astype(mm_dtype), w_ref[...].astype(mm_dtype),
                  preferred_element_type=jnp.float32)            # (nb*hh, wo)
    acc = acc + bias_ref[...]                                    # conv bias

    # --- InstanceNorm2d: per-(image, channel) stats over hh*wh pixels, single pass
    #     (E[x^2] - E[x]^2 in f32; selector matmuls paired to halve MXU pushes).
    npix = float(hh * wh)
    stacked = jnp.concatenate([acc, acc * acc], axis=0)          # (2*nb*hh, wo)
    sums = jnp.dot(stacked, r_ref[...],
                   preferred_element_type=jnp.float32)           # (2*nb*hh, cout)
    sums = jnp.sum(sums.reshape(2, nb, hh, cout), axis=2)        # (2, nb, cout)
    mean = sums[0] / npix
    var = sums[1] / npix - mean * mean                           # biased var (PyTorch IN)
    inv = lax.rsqrt(var + EPS)                                   # EUP slot
    scale = inv * g_ref[...]                                     # (nb, cout)
    shift = be_ref[...] - mean * scale                           # (nb, cout)

    # Broadcast (b, o) -> lane pattern j*cout+o via one paired selector matmul (MXU).
    ss = jnp.concatenate([scale, shift], axis=0)                 # (2*nb, cout)
    ss_l = jnp.dot(ss, t_ref[...], preferred_element_type=jnp.float32)  # (2*nb, wo)
    scale_l = ss_l[0:nb]
    shift_l = ss_l[nb:2 * nb]

    y = acc.reshape(nb, hh, wo) * scale_l[:, None, :] + shift_l[:, None, :]
    return jnp.maximum(y, 0.0)                                   # ReLU


def down_kernel(x_ref, w1_ref, b1_ref, g1_ref, be1_ref,
                w2_ref, b2_ref, g2_ref, be2_ref, r_ref, t_ref,
                o_ref, cat1_ref, cat2_ref,
                *, nb, hh, wh, cin, cout, mm_dtype):
    # --- MaxPool2d(2): 4 pre-split, lane-dense window taps -> pairwise VPU maxima.
    taps = x_ref[...]                                            # (nb, 4, hh, wh*cin)
    pooled = jnp.maximum(jnp.maximum(taps[:, 0], taps[:, 1]),
                         jnp.maximum(taps[:, 2], taps[:, 3]))    # (nb, hh, wh*cin)

    # --- ConvBlock: (conv3x3 + InstanceNorm + ReLU) x 2, one fused matmul per conv.
    _fill_cat(cat1_ref, pooled, nb, hh, wh * cin)
    y1 = _conv_in_relu(cat1_ref, w1_ref, b1_ref, g1_ref, be1_ref, r_ref, t_ref,
                       nb, hh, wh, cout, mm_dtype)               # (nb, hh, wh*cout)
    _fill_cat(cat2_ref, y1, nb, hh, wh * cout)
    y2 = _conv_in_relu(cat2_ref, w2_ref, b2_ref, g2_ref, be2_ref, r_ref, t_ref,
                       nb, hh, wh, cout, mm_dtype)

    o_ref[...] = y2                                              # lane-dense row layout


def _fused_banded_weights(w_flat, wh):
    """(9, Ci, Co) HWIO-flat 3x3 weights -> (3*wh*Ci, wh*Co) fused banded matrix.

    W[dy*wh*Ci + x*Ci + c, j*Co + o] = w[dy, x-j+1, c, o] for 0 <= x-j+1 <= 2, else 0.
    dy is folded into K (so one matmul does all 3 row taps), dx is folded into N via
    the band, and horizontal SAME padding is implicit (out-of-range dx columns at the
    left/right borders are simply absent from the band).
    """
    ci, co = w_flat.shape[1], w_flat.shape[2]
    w_hwio = w_flat.reshape(3, 3, ci, co).astype(jnp.float32)
    bw = jnp.zeros((3, wh * ci, wh * co), jnp.float32)
    for dx in range(3):
        for j in range(wh):
            x = j + dx - 1                                       # real input column
            if 0 <= x < wh:
                bw = bw.at[:, x * ci:(x + 1) * ci, j * co:(j + 1) * co].set(w_hwio[:, dx])
    return bw.reshape(3 * wh * ci, wh * co)


def down_pallas(x_nchw, params, *, matmul_dtype=jnp.float32):
    # matmul_dtype=jnp.bfloat16 is the native MXU path on v6e/v7x (use with a looser
    # tolerance); default f32 keeps the strict 1e-3 check against the f32 reference.
    (w1, b1, g1, be1, w2, b2, g2, be2) = params
    n, cin, h, w = x_nchw.shape
    hh, wh = h // 2, w // 2
    cout = w1.shape[-1]
    wo = wh * cout

    # ---- layout plumbing (no compute): NCHW -> lane-dense 2x2 pooling taps
    # x_taps[b, 2*di+dj, i, j*cin + c] = x[b, 2*i+di, 2*j+dj, c]
    x_nhwc = jnp.transpose(x_nchw, (0, 2, 3, 1)).astype(jnp.float32)
    x_taps = (x_nhwc.reshape(n, hh, 2, wh, 2, cin)
              .transpose(0, 2, 4, 1, 3, 5)
              .reshape(n, 4, hh, wh * cin))

    # ---- constant preparation (wrapper-side layout plumbing)
    bw1 = _fused_banded_weights(w1, wh)                          # (3*wh*cin,  wo)
    bw2 = _fused_banded_weights(w2, wh)                          # (3*wh*cout, wo)
    b1t = jnp.tile(b1.reshape(1, cout).astype(jnp.float32), (1, wh))   # (1, wo)
    b2t = jnp.tile(b2.reshape(1, cout).astype(jnp.float32), (1, wh))
    g1f = g1.reshape(1, cout).astype(jnp.float32)
    be1f = be1.reshape(1, cout).astype(jnp.float32)
    g2f = g2.reshape(1, cout).astype(jnp.float32)
    be2f = be2.reshape(1, cout).astype(jnp.float32)
    r_sel = jnp.tile(jnp.eye(cout, dtype=jnp.float32), (wh, 1))  # (wo, cout)
    t_sel = r_sel.T                                              # (cout, wo)

    kernel = functools.partial(down_kernel, nb=n, hh=hh, wh=wh, cin=cin,
                               cout=cout, mm_dtype=matmul_dtype)

    # NOTE: at these UNet-inter sizes the whole batch fits one VMEM-resident step.
    # For large N/H/W (esp. on v7x: 2 TCs, 64 MiB VMEM), tile the batch over a
    # "parallel" grid axis, set vmem_limit_bytes, and re-fill the cat scratch per step.
    out_rows = pl.pallas_call(
        kernel,
        out_shape=jax.ShapeDtypeStruct((n, hh, wo), jnp.float32),
        grid_spec=pltpu.PrefetchScalarGridSpec(
            num_scalar_prefetch=0,
            grid=(1,),
            in_specs=[
                pl.BlockSpec((n, 4, hh, wh * cin), lambda i: (0, 0, 0, 0)),
                pl.BlockSpec((3 * wh * cin, wo), lambda i: (0, 0)),
                pl.BlockSpec((1, wo), lambda i: (0, 0)),
                pl.BlockSpec((1, cout), lambda i: (0, 0)),
                pl.BlockSpec((1, cout), lambda i: (0, 0)),
                pl.BlockSpec((3 * wh * cout, wo), lambda i: (0, 0)),
                pl.BlockSpec((1, wo), lambda i: (0, 0)),
                pl.BlockSpec((1, cout), lambda i: (0, 0)),
                pl.BlockSpec((1, cout), lambda i: (0, 0)),
                pl.BlockSpec((wo, cout), lambda i: (0, 0)),
                pl.BlockSpec((cout, wo), lambda i: (0, 0)),
            ],
            out_specs=pl.BlockSpec((n, hh, wo), lambda i: (0, 0, 0)),
            scratch_shapes=[
                pltpu.VMEM((n, hh, 3 * wh * cin), jnp.float32),   # conv1 K-concat slabs
                pltpu.VMEM((n, hh, 3 * wh * cout), jnp.float32),  # conv2 K-concat slabs
            ],
        ),
        compiler_params=pltpu.CompilerParams(dimension_semantics=("arbitrary",)),
    )(x_taps, bw1, b1t, g1f, be1f, bw2, b2t, g2f, be2f, r_sel, t_sel)

    # lane-dense row slab -> NCHW (wrapper-side layout plumbing)
    return jnp.transpose(out_rows.reshape(n, hh, wh, cout), (0, 3, 1, 2))


# ----------------------------- pure-JAX reference -----------------------------
def down_reference(x_nchw, params):
    (w1, b1, g1, be1, w2, b2, g2, be2) = params
    n, cin, h, w = x_nchw.shape
    cout = w1.shape[-1]

    # MaxPool2d(2)
    xp = x_nchw.reshape(n, cin, h // 2, 2, w // 2, 2).max(axis=(3, 5))
    x = jnp.transpose(xp, (0, 2, 3, 1))                 # NHWC

    def conv(x, w_flat, b, ci):
        w_hwio = w_flat.reshape(3, 3, ci, cout)
        y = lax.conv_general_dilated(
            x, w_hwio, window_strides=(1, 1), padding="SAME",
            dimension_numbers=("NHWC", "HWIO", "NHWC"))
        return y + b.reshape(1, 1, 1, cout)

    def inorm(x, g, be):
        mean = x.mean(axis=(1, 2), keepdims=True)
        var = ((x - mean) ** 2).mean(axis=(1, 2), keepdims=True)
        return (x - mean) * lax.rsqrt(var + EPS) * g.reshape(1, 1, 1, -1) \
            + be.reshape(1, 1, 1, -1)

    y = jax.nn.relu(inorm(conv(x, w1, b1, cin), g1, be1))
    y = jax.nn.relu(inorm(conv(y, w2, b2, cout), g2, be2))
    return jnp.transpose(y, (0, 3, 1, 2))               # NCHW


if __name__ == "__main__":
    # Down(in_chans=4, out_chans=8, bias=True)
    N, CIN, H, W = 2, 4, 16, 16
    COUT = 8

    key = jax.random.PRNGKey(0)
    ks = jax.random.split(key, 9)
    x = jax.random.normal(ks[0], (N, CIN, H, W), jnp.float32)

    # deterministic synthetic parameters (weights stored flat as (9, Cin, Cout) == HWIO)
    w1 = jax.random.normal(ks[1], (9, CIN, COUT), jnp.float32) * 0.1
    b1 = jax.random.normal(ks[2], (1, COUT), jnp.float32) * 0.1
    g1 = 1.0 + jax.random.normal(ks[3], (1, COUT), jnp.float32) * 0.1
    be1 = jax.random.normal(ks[4], (1, COUT), jnp.float32) * 0.1
    w2 = jax.random.normal(ks[5], (9, COUT, COUT), jnp.float32) * 0.1
    b2 = jax.random.normal(ks[6], (1, COUT), jnp.float32) * 0.1
    g2 = 1.0 + jax.random.normal(ks[7], (1, COUT), jnp.float32) * 0.1
    be2 = jax.random.normal(ks[8], (1, COUT), jnp.float32) * 0.1
    params = (w1, b1, g1, be1, w2, b2, g2, be2)

    out = jax.jit(down_pallas)(x, params)
    out = jax.block_until_ready(out)

    ref = jax.block_until_ready(jax.jit(down_reference)(x, params))
    assert out.shape == (N, COUT, H // 2, W // 2), out.shape
    assert jnp.allclose(out, ref, atol=1e-3, rtol=1e-3), \
        f"max abs diff {jnp.max(jnp.abs(out - ref))}"

    print("KERNEL_OK")
</pallas_src>

<mosaic_0001>
module attributes {stable_mosaic.version = 11 : i64} {
  func.func @down_kernel(%arg0: i32, %arg1: memref<2x4x8x32xf32, #tpu.memory_space<vmem>>, %arg2: memref<96x64xf32, #tpu.memory_space<vmem>>, %arg3: memref<1x64xf32, #tpu.memory_space<vmem>>, %arg4: memref<1x8xf32, #tpu.memory_space<vmem>>, %arg5: memref<1x8xf32, #tpu.memory_space<vmem>>, %arg6: memref<192x64xf32, #tpu.memory_space<vmem>>, %arg7: memref<1x64xf32, #tpu.memory_space<vmem>>, %arg8: memref<1x8xf32, #tpu.memory_space<vmem>>, %arg9: memref<1x8xf32, #tpu.memory_space<vmem>>, %arg10: memref<64x8xf32, #tpu.memory_space<vmem>>, %arg11: memref<8x64xf32, #tpu.memory_space<vmem>>, %arg12: memref<2x8x64xf32, #tpu.memory_space<vmem>>, %arg13: memref<2x8x96xf32, #tpu.memory_space<vmem>>, %arg14: memref<2x8x192xf32, #tpu.memory_space<vmem>>) attributes {dimension_semantics = [#tpu.dimension_semantics<arbitrary>], iteration_bounds = array<i64: 1>, scalar_prefetch = 0 : i64, scratch_operands = 2 : i64, tpu.core_type = #tpu.core_type<tc>, window_params = [{pipeline_mode = #tpu.pipeline_mode<synchronous>, transform_indices = @transform_0, window_bounds = array<i64: 2, 4, 8, 32>}, {pipeline_mode = #tpu.pipeline_mode<synchronous>, transform_indices = @transform_1, window_bounds = array<i64: 96, 64>}, {pipeline_mode = #tpu.pipeline_mode<synchronous>, transform_indices = @transform_2, window_bounds = array<i64: 1, 64>}, {pipeline_mode = #tpu.pipeline_mode<synchronous>, transform_indices = @transform_3, window_bounds = array<i64: 1, 8>}, {pipeline_mode = #tpu.pipeline_mode<synchronous>, transform_indices = @transform_4, window_bounds = array<i64: 1, 8>}, {pipeline_mode = #tpu.pipeline_mode<synchronous>, transform_indices = @transform_5, window_bounds = array<i64: 192, 64>}, {pipeline_mode = #tpu.pipeline_mode<synchronous>, transform_indices = @transform_6, window_bounds = array<i64: 1, 64>}, {pipeline_mode = #tpu.pipeline_mode<synchronous>, transform_indices = @transform_7, window_bounds = array<i64: 1, 8>}, {pipeline_mode = #tpu.pipeline_mode<synchronous>, transform_indices = @transform_8, window_bounds = array<i64: 1, 8>}, {pipeline_mode = #tpu.pipeline_mode<synchronous>, transform_indices = @transform_9, window_bounds = array<i64: 64, 8>}, {pipeline_mode = #tpu.pipeline_mode<synchronous>, transform_indices = @transform_10, window_bounds = array<i64: 8, 64>}, {pipeline_mode = #tpu.pipeline_mode<synchronous>, transform_indices = @transform_11, window_bounds = array<i64: 2, 8, 64>}]} {
    %c0 = arith.constant 0 : index
    %c0_0 = arith.constant 0 : index
    %c0_1 = arith.constant 0 : index
    %c0_2 = arith.constant 0 : index
    %0 = vector.load %arg1[%c0, %c0_0, %c0_1, %c0_2] : memref<2x4x8x32xf32, #tpu.memory_space<vmem>>, vector<2x4x8x32xf32>
    %1 = vector.extract_strided_slice %0 {offsets = [0, 0, 0, 0], sizes = [2, 1, 8, 32], strides = [1, 1, 1, 1]} : vector<2x4x8x32xf32> to vector<2x1x8x32xf32>
    %2 = vector.shape_cast %1 : vector<2x1x8x32xf32> to vector<2x8x32xf32>
    %3 = vector.extract_strided_slice %0 {offsets = [0, 1, 0, 0], sizes = [2, 1, 8, 32], strides = [1, 1, 1, 1]} : vector<2x4x8x32xf32> to vector<2x1x8x32xf32>
    %4 = vector.shape_cast %3 : vector<2x1x8x32xf32> to vector<2x8x32xf32>
    %5 = arith.maximumf %2, %4 : vector<2x8x32xf32>
    %6 = vector.extract_strided_slice %0 {offsets = [0, 2, 0, 0], sizes = [2, 1, 8, 32], strides = [1, 1, 1, 1]} : vector<2x4x8x32xf32> to vector<2x1x8x32xf32>
    %7 = vector.shape_cast %6 : vector<2x1x8x32xf32> to vector<2x8x32xf32>
    %8 = vector.extract_strided_slice %0 {offsets = [0, 3, 0, 0], sizes = [2, 1, 8, 32], strides = [1, 1, 1, 1]} : vector<2x4x8x32xf32> to vector<2x1x8x32xf32>
    %9 = vector.shape_cast %8 : vector<2x1x8x32xf32> to vector<2x8x32xf32>
    %10 = arith.maximumf %7, %9 : vector<2x8x32xf32>
    %11 = arith.maximumf %5, %10 : vector<2x8x32xf32>
    %cst = arith.constant 0.000000e+00 : f32
    %12 = vector.broadcast %cst : f32 to vector<2x1x32xf32>
    %c0_3 = arith.constant 0 : index
    %c0_4 = arith.constant 0 : index
    %c0_5 = arith.constant 0 : index
    %13 = vector.load %arg13[%c0_3, %c0_4, %c0_5] : memref<2x8x96xf32, #tpu.memory_space<vmem>>, vector<2x1x32xf32>
    tpu.vector_store %arg13[%c0_3, %c0_4, %c0_5], %12 {strides = array<i32>} : memref<2x8x96xf32, #tpu.memory_space<vmem>>, vector<2x1x32xf32>,
    %14 = vector.extract_strided_slice %11 {offsets = [0, 0, 0], sizes = [2, 7, 32], strides = [1, 1, 1]} : vector<2x8x32xf32> to vector<2x7x32xf32>
    %c0_6 = arith.constant 0 : index
    %c1 = arith.constant 1 : index
    %c0_7 = arith.constant 0 : index
    %15 = vector.load %arg13[%c0_6, %c1, %c0_7] : memref<2x8x96xf32, #tpu.memory_space<vmem>>, vector<2x7x32xf32>
    tpu.vector_store %arg13[%c0_6, %c1, %c0_7], %14 {strides = array<i32>} : memref<2x8x96xf32, #tpu.memory_space<vmem>>, vector<2x7x32xf32>,
    %c0_8 = arith.constant 0 : index
    %c0_9 = arith.constant 0 : index
    %c32 = arith.constant 32 : index
    %16 = vector.load %arg13[%c0_8, %c0_9, %c32] : memref<2x8x96xf32, #tpu.memory_space<vmem>>, vector<2x8x32xf32>
    tpu.vector_store %arg13[%c0_8, %c0_9, %c32], %11 {strides = array<i32>} : memref<2x8x96xf32, #tpu.memory_space<vmem>>, vector<2x8x32xf32>,
    %17 = vector.extract_strided_slice %11 {offsets = [0, 1, 0], sizes = [2, 7, 32], strides = [1, 1, 1]} : vector<2x8x32xf32> to vector<2x7x32xf32>
    %c0_10 = arith.constant 0 : index
    %c0_11 = arith.constant 0 : index
    %c64 = arith.constant 64 : index
    %18 = vector.load %arg13[%c0_10, %c0_11, %c64] : memref<2x8x96xf32, #tpu.memory_space<vmem>>, vector<2x7x32xf32>
    tpu.vector_store %arg13[%c0_10, %c0_11, %c64], %17 {strides = array<i32>} : memref<2x8x96xf32, #tpu.memory_space<vmem>>, vector<2x7x32xf32>,
    %c0_12 = arith.constant 0 : index
    %c7 = arith.constant 7 : index
    %c64_13 = arith.constant 64 : index
    %19 = vector.load %arg13[%c0_12, %c7, %c64_13] : memref<2x8x96xf32, #tpu.memory_space<vmem>>, vector<2x1x32xf32>
    tpu.vector_store %arg13[%c0_12, %c7, %c64_13], %12 {strides = array<i32>} : memref<2x8x96xf32, #tpu.memory_space<vmem>>, vector<2x1x32xf32>,
    %c0_14 = arith.constant 0 : index
    %c0_15 = arith.constant 0 : index
    %c0_16 = arith.constant 0 : index
    %20 = vector.load %arg13[%c0_14, %c0_15, %c0_16] : memref<2x8x96xf32, #tpu.memory_space<vmem>>, vector<2x8x96xf32>
    %21 = vector.shape_cast %20 : vector<2x8x96xf32> to vector<16x96xf32>
    %c0_17 = arith.constant 0 : index
    %c0_18 = arith.constant 0 : index
    %22 = vector.load %arg2[%c0_17, %c0_18] : memref<96x64xf32, #tpu.memory_space<vmem>>, vector<96x64xf32>
    %cst_19 = arith.constant dense<0.000000e+00> : vector<16x64xf32>
    %23 = tpu.matmul %21, %22, %cst_19 {dimension_numbers = #tpu.dot_dimension_numbers<[1], [0], [0], [1], [0, 0, 1, 1], [], []>} : vector<16x96xf32>, vector<96x64xf32>, vector<16x64xf32> -> vector<16x64xf32>
    %c0_20 = arith.constant 0 : index
    %c0_21 = arith.constant 0 : index
    %24 = vector.load %arg3[%c0_20, %c0_21] : memref<1x64xf32, #tpu.memory_space<vmem>>, vector<1x64xf32>
    %25 = vector.broadcast %24 : vector<1x64xf32> to vector<16x64xf32>
    %26 = arith.addf %23, %25 : vector<16x64xf32>
    %27 = arith.mulf %26, %26 : vector<16x64xf32>
    %28 = tpu.concatenate %26, %27 in 0 : vector<16x64xf32>, vector<16x64xf32> -> vector<32x64xf32>
    %c0_22 = arith.constant 0 : index
    %c0_23 = arith.constant 0 : index
    %29 = vector.load %arg10[%c0_22, %c0_23] : memref<64x8xf32, #tpu.memory_space<vmem>>, vector<64x8xf32>
    %cst_24 = arith.constant dense<0.000000e+00> : vector<32x8xf32>
    %30 = tpu.matmul %28, %29, %cst_24 {dimension_numbers = #tpu.dot_dimension_numbers<[1], [0], [0], [1], [0, 0, 1, 1], [], []>} : vector<32x64xf32>, vector<64x8xf32>, vector<32x8xf32> -> vector<32x8xf32>
    %31 = vector.shape_cast %30 : vector<32x8xf32> to vector<2x2x8x8xf32>
    %cst_25 = arith.constant dense<0.000000e+00> : vector<2x2x8xf32>
    %32 = vector.multi_reduction <add>, %31, %cst_25 [2] : vector<2x2x8x8xf32> to vector<2x2x8xf32>
    %33 = vector.extract_strided_slice %32 {offsets = [0, 0, 0], sizes = [1, 2, 8], strides = [1, 1, 1]} : vector<2x2x8xf32> to vector<1x2x8xf32>
    %34 = vector.shape_cast %33 : vector<1x2x8xf32> to vector<2x8xf32>
    %cst_26 = arith.constant 6.400000e+01 : f32
    %35 = vector.broadcast %cst_26 : f32 to vector<2x8xf32>
    %36 = arith.divf %34, %35 : vector<2x8xf32>
    %37 = vector.extract_strided_slice %32 {offsets = [1, 0, 0], sizes = [1, 2, 8], strides = [1, 1, 1]} : vector<2x2x8xf32> to vector<1x2x8xf32>
    %38 = vector.shape_cast %37 : vector<1x2x8xf32> to vector<2x8xf32>
    %cst_27 = arith.constant 6.400000e+01 : f32
    %39 = vector.broadcast %cst_27 : f32 to vector<2x8xf32>
    %40 = arith.divf %38, %39 : vector<2x8xf32>
    %41 = arith.mulf %36, %36 : vector<2x8xf32>
    %42 = arith.subf %40, %41 : vector<2x8xf32>
    %cst_28 = arith.constant 9.99999974E-6 : f32
    %43 = vector.broadcast %cst_28 : f32 to vector<2x8xf32>
    %44 = arith.addf %42, %43 : vector<2x8xf32>
    %45 = math.rsqrt %44 : vector<2x8xf32>
    %c0_29 = arith.constant 0 : index
    %c0_30 = arith.constant 0 : index
    %46 = vector.load %arg4[%c0_29, %c0_30] : memref<1x8xf32, #tpu.memory_space<vmem>>, vector<1x8xf32>
    %47 = vector.broadcast %46 : vector<1x8xf32> to vector<2x8xf32>
    %48 = arith.mulf %45, %47 : vector<2x8xf32>
    %c0_31 = arith.constant 0 : index
    %c0_32 = arith.constant 0 : index
    %49 = vector.load %arg5[%c0_31, %c0_32] : memref<1x8xf32, #tpu.memory_space<vmem>>, vector<1x8xf32>
    %50 = arith.mulf %36, %48 : vector<2x8xf32>
    %51 = vector.broadcast %49 : vector<1x8xf32> to vector<2x8xf32>
    %52 = arith.subf %51, %50 : vector<2x8xf32>
    %53 = tpu.concatenate %48, %52 in 0 : vector<2x8xf32>, vector<2x8xf32> -> vector<4x8xf32>
    %c0_33 = arith.constant 0 : index
    %c0_34 = arith.constant 0 : index
    %54 = vector.load %arg11[%c0_33, %c0_34] : memref<8x64xf32, #tpu.memory_space<vmem>>, vector<8x64xf32>
    %cst_35 = arith.constant dense<0.000000e+00> : vector<4x64xf32>
    %55 = tpu.matmul %53, %54, %cst_35 {dimension_numbers = #tpu.dot_dimension_numbers<[1], [0], [0], [1], [0, 0, 1, 1], [], []>} : vector<4x8xf32>, vector<8x64xf32>, vector<4x64xf32> -> vector<4x64xf32>
    %56 = vector.extract_strided_slice %55 {offsets = [0, 0], sizes = [2, 64], strides = [1, 1]} : vector<4x64xf32> to vector<2x64xf32>
    %57 = vector.extract_strided_slice %55 {offsets = [2, 0], sizes = [2, 64], strides = [1, 1]} : vector<4x64xf32> to vector<2x64xf32>
    %58 = vector.shape_cast %26 : vector<16x64xf32> to vector<2x8x64xf32>
    %59 = vector.shape_cast %56 : vector<2x64xf32> to vector<2x1x64xf32>
    %60 = vector.broadcast %59 : vector<2x1x64xf32> to vector<2x8x64xf32>
    %61 = arith.mulf %58, %60 : vector<2x8x64xf32>
    %62 = vector.shape_cast %57 : vector<2x64xf32> to vector<2x1x64xf32>
    %63 = vector.broadcast %62 : vector<2x1x64xf32> to vector<2x8x64xf32>
    %64 = arith.addf %61, %63 : vector<2x8x64xf32>
    %cst_36 = arith.constant 0.000000e+00 : f32
    %65 = vector.broadcast %cst_36 : f32 to vector<2x8x64xf32>
    %66 = arith.maximumf %64, %65 : vector<2x8x64xf32>
    %cst_37 = arith.constant 0.000000e+00 : f32
    %67 = vector.broadcast %cst_37 : f32 to vector<2x1x64xf32>
    %c0_38 = arith.constant 0 : index
    %c0_39 = arith.constant 0 : index
    %c0_40 = arith.constant 0 : index
    %68 = vector.load %arg14[%c0_38, %c0_39, %c0_40] : memref<2x8x192xf32, #tpu.memory_space<vmem>>, vector<2x1x64xf32>
    tpu.vector_store %arg14[%c0_38, %c0_39, %c0_40], %67 {strides = array<i32>} : memref<2x8x192xf32, #tpu.memory_space<vmem>>, vector<2x1x64xf32>,
    %69 = vector.extract_strided_slice %66 {offsets = [0, 0, 0], sizes = [2, 7, 64], strides = [1, 1, 1]} : vector<2x8x64xf32> to vector<2x7x64xf32>
    %c0_41 = arith.constant 0 : index
    %c1_42 = arith.constant 1 : index
    %c0_43 = arith.constant 0 : index
    %70 = vector.load %arg14[%c0_41, %c1_42, %c0_43] : memref<2x8x192xf32, #tpu.memory_space<vmem>>, vector<2x7x64xf32>
    tpu.vector_store %arg14[%c0_41, %c1_42, %c0_43], %69 {strides = array<i32>} : memref<2x8x192xf32, #tpu.memory_space<vmem>>, vector<2x7x64xf32>,
    %c0_44 = arith.constant 0 : index
    %c0_45 = arith.constant 0 : index
    %c64_46 = arith.constant 64 : index
    %71 = vector.load %arg14[%c0_44, %c0_45, %c64_46] : memref<2x8x192xf32, #tpu.memory_space<vmem>>, vector<2x8x64xf32>
    tpu.vector_store %arg14[%c0_44, %c0_45, %c64_46], %66 {strides = array<i32>} : memref<2x8x192xf32, #tpu.memory_space<vmem>>, vector<2x8x64xf32>,
    %72 = vector.extract_strided_slice %66 {offsets = [0, 1, 0], sizes = [2, 7, 64], strides = [1, 1, 1]} : vector<2x8x64xf32> to vector<2x7x64xf32>
    %c0_47 = arith.constant 0 : index
    %c0_48 = arith.constant 0 : index
    %c128 = arith.constant 128 : index
    %73 = vector.load %arg14[%c0_47, %c0_48, %c128] : memref<2x8x192xf32, #tpu.memory_space<vmem>>, vector<2x7x64xf32>
    tpu.vector_store %arg14[%c0_47, %c0_48, %c128], %72 {strides = array<i32>} : memref<2x8x192xf32, #tpu.memory_space<vmem>>, vector<2x7x64xf32>,
    %c0_49 = arith.constant 0 : index
    %c7_50 = arith.constant 7 : index
    %c128_51 = arith.constant 128 : index
    %74 = vector.load %arg14[%c0_49, %c7_50, %c128_51] : memref<2x8x192xf32, #tpu.memory_space<vmem>>, vector<2x1x64xf32>
    tpu.vector_store %arg14[%c0_49, %c7_50, %c128_51], %67 {strides = array<i32>} : memref<2x8x192xf32, #tpu.memory_space<vmem>>, vector<2x1x64xf32>,
    %c0_52 = arith.constant 0 : index
    %c0_53 = arith.constant 0 : index
    %c0_54 = arith.constant 0 : index
    %75 = vector.load %arg14[%c0_52, %c0_53, %c0_54] : memref<2x8x192xf32, #tpu.memory_space<vmem>>, vector<2x8x192xf32>
    %76 = vector.shape_cast %75 : vector<2x8x192xf32> to vector<16x192xf32>
    %c0_55 = arith.constant 0 : index
    %c0_56 = arith.constant 0 : index
    %77 = vector.load %arg6[%c0_55, %c0_56] : memref<192x64xf32, #tpu.memory_space<vmem>>, vector<192x64xf32>
    %cst_57 = arith.constant dense<0.000000e+00> : vector<16x64xf32>
    %78 = tpu.matmul %76, %77, %cst_57 {dimension_numbers = #tpu.dot_dimension_numbers<[1], [0], [0], [1], [0, 0, 1, 1], [], []>} : vector<16x192xf32>, vector<192x64xf32>, vector<16x64xf32> -> vector<16x64xf32>
    %c0_58 = arith.constant 0 : index
    %c0_59 = arith.constant 0 : index
    %79 = vector.load %arg7[%c0_58, %c0_59] : memref<1x64xf32, #tpu.memory_space<vmem>>, vector<1x64xf32>
    %80 = vector.broadcast %79 : vector<1x64xf32> to vector<16x64xf32>
    %81 = arith.addf %78, %80 : vector<16x64xf32>
    %82 = arith.mulf %81, %81 : vector<16x64xf32>
    %83 = tpu.concatenate %81, %82 in 0 : vector<16x64xf32>, vector<16x64xf32> -> vector<32x64xf32>
    %c0_60 = arith.constant 0 : index
    %c0_61 = arith.constant 0 : index
    %84 = vector.load %arg10[%c0_60, %c0_61] : memref<64x8xf32, #tpu.memory_space<vmem>>, vector<64x8xf32>
    %cst_62 = arith.constant dense<0.000000e+00> : vector<32x8xf32>
    %85 = tpu.matmul %83, %84, %cst_62 {dimension_numbers = #tpu.dot_dimension_numbers<[1], [0], [0], [1], [0, 0, 1, 1], [], []>} : vector<32x64xf32>, vector<64x8xf32>, vector<32x8xf32> -> vector<32x8xf32>
    %86 = vector.shape_cast %85 : vector<32x8xf32> to vector<2x2x8x8xf32>
    %cst_63 = arith.constant dense<0.000000e+00> : vector<2x2x8xf32>
    %87 = vector.multi_reduction <add>, %86, %cst_63 [2] : vector<2x2x8x8xf32> to vector<2x2x8xf32>
    %88 = vector.extract_strided_slice %87 {offsets = [0, 0, 0], sizes = [1, 2, 8], strides = [1, 1, 1]} : vector<2x2x8xf32> to vector<1x2x8xf32>
    %89 = vector.shape_cast %88 : vector<1x2x8xf32> to vector<2x8xf32>
    %cst_64 = arith.constant 6.400000e+01 : f32
    %90 = vector.broadcast %cst_64 : f32 to vector<2x8xf32>
    %91 = arith.divf %89, %90 : vector<2x8xf32>
    %92 = vector.extract_strided_slice %87 {offsets = [1, 0, 0], sizes = [1, 2, 8], strides = [1, 1, 1]} : vector<2x2x8xf32> to vector<1x2x8xf32>
    %93 = vector.shape_cast %92 : vector<1x2x8xf32> to vector<2x8xf32>
    %cst_65 = arith.constant 6.400000e+01 : f32
    %94 = vector.broadcast %cst_65 : f32 to vector<2x8xf32>
    %95 = arith.divf %93, %94 : vector<2x8xf32>
    %96 = arith.mulf %91, %91 : vector<2x8xf32>
    %97 = arith.subf %95, %96 : vector<2x8xf32>
    %cst_66 = arith.constant 9.99999974E-6 : f32
    %98 = vector.broadcast %cst_66 : f32 to vector<2x8xf32>
    %99 = arith.addf %97, %98 : vector<2x8xf32>
    %100 = math.rsqrt %99 : vector<2x8xf32>
    %c0_67 = arith.constant 0 : index
    %c0_68 = arith.constant 0 : index
    %101 = vector.load %arg8[%c0_67, %c0_68] : memref<1x8xf32, #tpu.memory_space<vmem>>, vector<1x8xf32>
    %102 = vector.broadcast %101 : vector<1x8xf32> to vector<2x8xf32>
    %103 = arith.mulf %100, %102 : vector<2x8xf32>
    %c0_69 = arith.constant 0 : index
    %c0_70 = arith.constant 0 : index
    %104 = vector.load %arg9[%c0_69, %c0_70] : memref<1x8xf32, #tpu.memory_space<vmem>>, vector<1x8xf32>
    %105 = arith.mulf %91, %103 : vector<2x8xf32>
    %106 = vector.broadcast %104 : vector<1x8xf32> to vector<2x8xf32>
    %107 = arith.subf %106, %105 : vector<2x8xf32>
    %108 = tpu.concatenate %103, %107 in 0 : vector<2x8xf32>, vector<2x8xf32> -> vector<4x8xf32>
    %c0_71 = arith.constant 0 : index
    %c0_72 = arith.constant 0 : index
    %109 = vector.load %arg11[%c0_71, %c0_72] : memref<8x64xf32, #tpu.memory_space<vmem>>, vector<8x64xf32>
    %cst_73 = arith.constant dense<0.000000e+00> : vector<4x64xf32>
    %110 = tpu.matmul %108, %109, %cst_73 {dimension_numbers = #tpu.dot_dimension_numbers<[1], [0], [0], [1], [0, 0, 1, 1], [], []>} : vector<4x8xf32>, vector<8x64xf32>, vector<4x64xf32> -> vector<4x64xf32>
    %111 = vector.extract_strided_slice %110 {offsets = [0, 0], sizes = [2, 64], strides = [1, 1]} : vector<4x64xf32> to vector<2x64xf32>
    %112 = vector.extract_strided_slice %110 {offsets = [2, 0], sizes = [2, 64], strides = [1, 1]} : vector<4x64xf32> to vector<2x64xf32>
    %113 = vector.shape_cast %81 : vector<16x64xf32> to vector<2x8x64xf32>
    %114 = vector.shape_cast %111 : vector<2x64xf32> to vector<2x1x64xf32>
    %115 = vector.broadcast %114 : vector<2x1x64xf32> to vector<2x8x64xf32>
    %116 = arith.mulf %113, %115 : vector<2x8x64xf32>
    %117 = vector.shape_cast %112 : vector<2x64xf32> to vector<2x1x64xf32>
    %118 = vector.broadcast %117 : vector<2x1x64xf32> to vector<2x8x64xf32>
    %119 = arith.addf %116, %118 : vector<2x8x64xf32>
    %cst_74 = arith.constant 0.000000e+00 : f32
    %120 = vector.broadcast %cst_74 : f32 to vector<2x8x64xf32>
    %121 = arith.maximumf %119, %120 : vector<2x8x64xf32>
    %c0_75 = arith.constant 0 : index
    %c0_76 = arith.constant 0 : index
    %c0_77 = arith.constant 0 : index
    %122 = vector.load %arg12[%c0_75, %c0_76, %c0_77] : memref<2x8x64xf32, #tpu.memory_space<vmem>>, vector<2x8x64xf32>
    tpu.vector_store %arg12[%c0_75, %c0_76, %c0_77], %121 {strides = array<i32>} : memref<2x8x64xf32, #tpu.memory_space<vmem>>, vector<2x8x64xf32>,
    return
  }
  func.func @transform_0(%arg0: i32) -> (i32, i32, i32, i32) {
    %c0_i32 = arith.constant 0 : i32
    %c0_i32_0 = arith.constant 0 : i32
    %c0_i32_1 = arith.constant 0 : i32
    %c0_i32_2 = arith.constant 0 : i32
    %c0_i32_3 = arith.constant 0 : i32
    return %c0_i32, %c0_i32_0, %c0_i32_1, %c0_i32_2 : i32, i32, i32, i32
  }
  func.func @transform_1(%arg0: i32) -> (i32, i32) {
    %c0_i32 = arith.constant 0 : i32
    %c0_i32_0 = arith.constant 0 : i32
    %c0_i32_1 = arith.constant 0 : i32
    return %c0_i32, %c0_i32_0 : i32, i32
  }
  func.func @transform_2(%arg0: i32) -> (i32, i32) {
    %c0_i32 = arith.constant 0 : i32
    %c0_i32_0 = arith.constant 0 : i32
    %c0_i32_1 = arith.constant 0 : i32
    return %c0_i32, %c0_i32_0 : i32, i32
  }
  func.func @transform_3(%arg0: i32) -> (i32, i32) {
    %c0_i32 = arith.constant 0 : i32
    %c0_i32_0 = arith.constant 0 : i32
    %c0_i32_1 = arith.constant 0 : i32
    return %c0_i32, %c0_i32_0 : i32, i32
  }
  func.func @transform_4(%arg0: i32) -> (i32, i32) {
    %c0_i32 = arith.constant 0 : i32
    %c0_i32_0 = arith.constant 0 : i32
    %c0_i32_1 = arith.constant 0 : i32
    return %c0_i32, %c0_i32_0 : i32, i32
  }
  func.func @transform_5(%arg0: i32) -> (i32, i32) {
    %c0_i32 = arith.constant 0 : i32
    %c0_i32_0 = arith.constant 0 : i32
    %c0_i32_1 = arith.constant 0 : i32
    return %c0_i32, %c0_i32_0 : i32, i32
  }
  func.func @transform_6(%arg0: i32) -> (i32, i32) {
    %c0_i32 = arith.constant 0 : i32
    %c0_i32_0 = arith.constant 0 : i32
    %c0_i32_1 = arith.constant 0 : i32
    return %c0_i32, %c0_i32_0 : i32, i32
  }
  func.func @transform_7(%arg0: i32) -> (i32, i32) {
    %c0_i32 = arith.constant 0 : i32
    %c0_i32_0 = arith.constant 0 : i32
    %c0_i32_1 = arith.constant 0 : i32
    return %c0_i32, %c0_i32_0 : i32, i32
  }
  func.func @transform_8(%arg0: i32) -> (i32, i32) {
    %c0_i32 = arith.constant 0 : i32
    %c0_i32_0 = arith.constant 0 : i32
    %c0_i32_1 = arith.constant 0 : i32
    return %c0_i32, %c0_i32_0 : i32, i32
  }
  func.func @transform_9(%arg0: i32) -> (i32, i32) {
    %c0_i32 = arith.constant 0 : i32
    %c0_i32_0 = arith.constant 0 : i32
    %c0_i32_1 = arith.constant 0 : i32
    return %c0_i32, %c0_i32_0 : i32, i32
  }
  func.func @transform_10(%arg0: i32) -> (i32, i32) {
    %c0_i32 = arith.constant 0 : i32
    %c0_i32_0 = arith.constant 0 : i32
    %c0_i32_1 = arith.constant 0 : i32
    return %c0_i32, %c0_i32_0 : i32, i32
  }
  func.func @transform_11(%arg0: i32) -> (i32, i32, i32) {
    %c0_i32 = arith.constant 0 : i32
    %c0_i32_0 = arith.constant 0 : i32
    %c0_i32_1 = arith.constant 0 : i32
    %c0_i32_2 = arith.constant 0 : i32
    return %c0_i32, %c0_i32_0, %c0_i32_1 : i32, i32, i32
  }
}

</mosaic_0001>

<bundles_post_ra>
// kernel: tile.29
= control target key start
LH: loop header
LB: loop body
LE: loop exit
PB: predicated region body
PF: predicated region fallthrough
CT: control target
= control target key end

     0   :  { %vm4_vm0 = vcmask 1047556   ;;  %s99_s14 = smov 56   ;;  %s100_s15 = smov 40   ;;  %vm6_vm1 = vcmask 64512   ;;  %vm16_vm2 = vcmask 523712   ;;  %vm26_vm3 = vcmask 458112   ;;  %s196_s0 = inlined_call_operand.vmem [shape: f32[8,8,8], index: 0, kind: input, shape index: {}]   ;;  %s197_s1 = inlined_call_operand.vmem [shape: f32[64,8], index: 1, kind: output, shape index: {}]  }
   0x1   :  { %v78_v0 = vld [vmem:[%s196_s0 + $0x7] ss:$8 sm:$0xf]   ;;  %v82_v3 = vld [vmem:[%s196_s0 + $0x5] ss:$8 sm:$0xf]  }
   0x2   :  { %v79_v1 = vld [vmem:[%s196_s0 + $0x7] ss:$8 sm:$0xf0]   ;;  %v83_v4 = vld [vmem:[%s196_s0 + $0x5] ss:$8 sm:$0xf0]  }
   0x3   :  { %v13_v2 = vsel %vm4_vm0, %v79_v1, %v78_v0  ;;  %v33_v5 = vsel %vm4_vm0, %v83_v4, %v82_v3  ;;  %v80_v6 = vld [vmem:[%s196_s0 + $0x6] ss:$8 sm:$0xf]   ;;  %v84_v8 = vld [vmem:[%s196_s0 + $0x4] ss:$8 sm:$0xf]  }
   0x4   :  { %14 = vrot.lane.b32.xlu0 %v13_v2, %s99_s14  ;;  %34 = vrot.lane.b32.xlu1 %v33_v5, %s100_s15  ;;  %v81_v7 = vld [vmem:[%s196_s0 + $0x6] ss:$8 sm:$0xf0]   ;;  %v85_v9 = vld [vmem:[%s196_s0 + $0x4] ss:$8 sm:$0xf0]  }
   0x5   :  { %v86_v10 = vld [vmem:[%s196_s0 + $0x3] ss:$8 sm:$0xf]   ;;  %v23_v12 = vsel %vm4_vm0, %v81_v7, %v80_v6  ;;  %v43_v14 = vsel %vm4_vm0, %v85_v9, %v84_v8  ;;  %s101_s28 = smov 24   ;;  %s102_s29 = smov 48   ;;  %vm36_vm4 = vcmask 392512  }
   0x6   :  { %v87_v11 = vld [vmem:[%s196_s0 + $0x3] ss:$8 sm:$0xf0]   ;;  %v88_v15 = vld [vmem:[%s196_s0 + $0x2] ss:$8 sm:$0xf]  }
   0x7   :  { %v53_v13 = vsel %vm4_vm0, %v87_v11, %v86_v10  ;;  %v89_v16 = vld [vmem:[%s196_s0 + $0x2] ss:$8 sm:$0xf0]   ;;  %s103_s5 = smov 32   ;;  %s104_s10 = smov 16   ;;  %vm46_vm5 = vcmask 326912  }
   0x8   :  { %54 = vrot.lane.b32.xlu2 %v53_v13, %s101_s28  ;;  %v90_v17 = vld [vmem:[%s196_s0 + $0x1] ss:$8 sm:$0xf]   ;;  %v63_v19 = vsel %vm4_vm0, %v89_v16, %v88_v15  ;;  %s105_s11 = smov 8   ;;  %vm56_vm6 = vcmask 261312   ;;  %vm66_vm7 = vcmask 195712  }
   0x9   :  { %v91_v18 = vld [vmem:[%s196_s0 + $0x1] ss:$8 sm:$0xf0]   ;;  %v2_v21 = vld [vmem:[%s196_s0] ss:$8 sm:$0xf]  }
   0xa   :  { %v73_v20 = vsel %vm4_vm0, %v91_v18, %v90_v17  ;;  %v3_v22 = vld [vmem:[%s196_s0] ss:$8 sm:$0xf0]   ;;  %vm76_vm8 = vcmask 130112  }
   0xb   :  { %v5_v23 = vsel %vm4_vm0, %v3_v22, %v2_v21 }
   0xc   :  { %24 = vrot.lane.b32.xlu0 %v23_v12, %s102_s29  ;;  %44 = vrot.lane.b32.xlu1 %v43_v14, %s103_s5  ;;  %7 = vst.msk [vmem:[%s197_s1] sm:$0xff] %vm6_vm1, %v5_v23  }
  0x10   :  { %64 = vrot.lane.b32.xlu2 %v63_v19, %s104_s10 }
  0x14   :  { %74 = vrot.lane.b32.xlu0 %v73_v20, %s105_s11 }
  0x62   :  { %v55_v24 = vpop.permute.xlu2 %54  }
  0x6a   :  { %v65_v25 = vpop.permute.xlu2 %64  }
  0x76   :  { %v15_v26 = vpop.permute.xlu0 %14   ;;  %v35_v27 = vpop.permute.xlu1 %34  }
  0x77   :  { %17 = vst.msk [vmem:[%s197_s1] sm:$0xff] %vm16_vm2, %v15_v26  }
  0x7e   :  { %v25_v28 = vpop.permute.xlu0 %24   ;;  %v45_v29 = vpop.permute.xlu1 %44  }
  0x7f   :  { %27 = vst.msk [vmem:[%s197_s1] sm:$0xff] %vm26_vm3, %v25_v28  }
  0x80   :  { %37 = vst.msk [vmem:[%s197_s1] sm:$0xff] %vm36_vm4, %v35_v27  }
  0x81   :  { %47 = vst.msk [vmem:[%s197_s1] sm:$0xff] %vm46_vm5, %v45_v29  }
  0x82   :  { %57 = vst.msk [vmem:[%s197_s1] sm:$0xff] %vm56_vm6, %v55_v24  }
  0x83   :  { %67 = vst.msk [vmem:[%s197_s1] sm:$0xff] %vm66_vm7, %v65_v25  }
  0x86   :  { %v75_v30 = vpop.permute.xlu0 %74  }
  0x87   :  { %77 = vst.msk [vmem:[%s197_s1] sm:$0xff] %vm76_vm8, %v75_v30  }

// kernel: down_pallas.1
= control target key start
LH: loop header
LB: loop body
LE: loop exit
PB: predicated region body
PF: predicated region fallthrough
CT: control target
= control target key end

     0   :  { %vm52_vm0 = vcmask 253952   ;;  %v664_v3 = vmov 0.0   ;;  %vm55_vm1 = vcmask 260096   ;;  %s666_s22 = smov 64   ;;  %vm66_vm2 = vcmask 523520   ;;  %s1025_s0 = inlined_call_operand.vmem [shape: f32[2,4,8,32], index: 0, kind: input, shape index: {}]   ;;  %s1026_s1 = inlined_call_operand.vmem [shape: f32[96,64], index: 1, kind: input, shape index: {}]   ;;  %s1027_s2 = inlined_call_operand.vmem [shape: f32[1,64], index: 2, kind: input, shape index: {}]   ;;  %s1028_s9 = inlined_call_operand.vmem [shape: f32[64,8], index: 9, kind: input, shape index: {}]   ;;  %s1029_s3 = inlined_call_operand.vmem [shape: f32[1,8], index: 3, kind: input, shape index: {}]   ;;  %s1030_s4 = inlined_call_operand.vmem [shape: f32[1,8], index: 4, kind: input, shape index: {}]   ;;  %s1031_s10 = inlined_call_operand.vmem [shape: f32[8,64], index: 10, kind: input, shape index: {}]   ;;  %s1032_s5 = inlined_call_operand.vmem [shape: f32[192,64], index: 5, kind: input, shape index: {}]   ;;  %s1033_s6 = inlined_call_operand.vmem [shape: f32[1,64], index: 6, kind: input, shape index: {}]   ;;  %s1034_s7 = inlined_call_operand.vmem [shape: f32[1,8], index: 7, kind: input, shape index: {}]   ;;  %s1035_s8 = inlined_call_operand.vmem [shape: f32[1,8], index: 8, kind: input, shape index: {}]   ;;  %s1036_s11 = inlined_call_operand.vmem [shape: f32[2,8,64], index: 11, kind: output, shape index: {}]  }
   0x1   :  { %v38_v0 = vld [vmem:[%s1025_s0] sm:$0xff]  ;;  %v39_v1 = vld [vmem:[%s1025_s0 + $0x8] sm:$0xff]  ;;  %v40_v2 = vld [vmem:[%s1025_s0 + $0x10] sm:$0xff]  ;;  %53 = vst.msk [vmem:[#allocation2] sm:$0x1] %vm52_vm0, %v664_v3  ;;  %vm78_vm3 = vcmask 778752  }
   0x2   :  { %v41_v4 = vld [vmem:[%s1025_s0 + $0x18] sm:$0xff]  ;;  %v46_v5 = vmax.f32 %v38_v0, %v39_v1  ;;  %v42_v6 = vld [vmem:[%s1025_s0 + $0x20] sm:$0xff]  ;;  %v43_v7 = vld [vmem:[%s1025_s0 + $0x28] sm:$0xff]  ;;  %54 = vst.msk [vmem:[#allocation2 + $0x8] sm:$0x1] %vm52_vm0, %v664_v3  ;;  %vm75_vm4 = vcmask 785921  }
   0x3   :  { %v48_v8 = vmax.f32 %v40_v2, %v41_v4  ;;  %v44_v9 = vld [vmem:[%s1025_s0 + $0x30] sm:$0xff]  ;;  %v45_v10 = vld [vmem:[%s1025_s0 + $0x38] sm:$0xff]  ;;  %v47_v11 = vmax.f32 %v42_v6, %v43_v7  ;;  %v92_v16 = vld [vmem:[%s1026_s1 + $0x48] sm:$0xff]  ;;  %s665_s0 = smov 32   ;;  %vm99_vm5 = vcmask 785408   ;;  %vm139_vm6 = vcmask 523264  }
   0x4   :  { %v94_v12 = vld [vmem:[%s1026_s1 + $0x58] sm:$0xff]  ;;  %v49_v13 = vmax.f32 %v44_v9, %v45_v10  ;;  %v93_v14 = vld [vmem:[%s1026_s1 + $0x50] sm:$0xff]  ;;  %v91_v18 = vld [vmem:[%s1026_s1 + $0x40] sm:$0xff]  ;;  %vm181_vm7 = vcmask 64512   ;;  %v667_v48 = vmov 64.0   ;;  %vm262_vm15 = vcmask 1041409  }
   0x5   :  { %110 = vmatpush.msra.mxu0 %v94_v12  ;;  %v50_v15 = vmax.f32 %v46_v5, %v48_v8  ;;  %v90_v19 = vld [vmem:[%s1026_s1 + $0x38] sm:$0xff]  ;;  %v89_v20 = vld [vmem:[%s1026_s1 + $0x30] sm:$0xff]  ;;  %v88_v21 = vld [vmem:[%s1026_s1 + $0x28] sm:$0xff]  ;;  %654 = vrcp.f32 %v667_v48  ;;  %vm274_vm0 = vcmask 1041408  }
   0x6   :  { %v51_v17 = vmax.f32 %v47_v11, %v49_v13  ;;  %v87_v22 = vld [vmem:[%s1026_s1 + $0x20] sm:$0xff]  ;;  %v86_v23 = vld [vmem:[%s1026_s1 + $0x18] sm:$0xff]  ;;  %v85_v24 = vld [vmem:[%s1026_s1 + $0x10] sm:$0xff] }
   0x7   :  { %111 = vmatpush.msra.mxu0 %v93_v14  ;;  %60 = vrot.lane.b32.xlu0 %v50_v15, %s665_s0  ;;  %56 = vst.msk [vmem:[#allocation2 + $0x1] sm:$0x7f] %vm55_vm1, %v50_v15  ;;  %v84_v25 = vld [vmem:[%s1026_s1 + $0x8] sm:$0xff]  ;;  %v83_v26 = vld [vmem:[%s1026_s1] sm:$0xff]  ;;  %v795_v27 = vld [vmem:[%s1028_s9 + $0x38] sm:$0xff] }
   0x8   :  { %62 = vrot.lane.b32.xlu1 %v51_v17, %s665_s0  ;;  %57 = vst.msk [vmem:[#allocation2 + $0x9] sm:$0x7f] %vm55_vm1, %v51_v17  ;;  %v800_v28 = vld [vmem:[%s1028_s9 + $0x30] sm:$0xff]  ;;  %160 = vmatpush.msra.mxu1 %v795_v27  ;;  %v807_v29 = vld [vmem:[%s1028_s9 + $0x28] sm:$0xff]  ;;  %v814_v30 = vld [vmem:[%s1028_s9 + $0x20] sm:$0xff]  ;;  %vm321_vm1 = vcmask 516096  }
   0x9   :  { %112 = vmatpush.msra.mxu0 %v92_v16  ;;  %v821_v31 = vld [vmem:[%s1028_s9 + $0x18] sm:$0xff]  ;;  %v828_v34 = vld [vmem:[%s1028_s9 + $0x10] sm:$0xff]  ;;  %v839_v39 = vld [vmem:[%s1028_s9 + $0x8] sm:$0xff]  ;;  %349 = vst.msk [vmem:[#allocation3 + $0xf] sm:$0x1] %vm321_vm1, %v664_v3 }
   0xa   :  { %161 = vmatpush.msra.mxu1 %v800_v28  ;;  %v846_v40 = vld [vmem:[%s1028_s9] sm:$0xff]  ;;  %322 = vst.msk [vmem:[#allocation3] sm:$0x1] %vm321_vm1, %v664_v3 }
   0xb   :  { %113 = vmatpush.msra.mxu0 %v91_v18  ;;  %v648_v41 = vld [vmem:[%s1027_s2] ss:$0 sm:$0xff]  ;;  %v655_v52 = vpop.eup %654  ;;  %323 = vst.msk [vmem:[#allocation3 + $0x10] sm:$0x1] %vm321_vm1, %v664_v3 }
   0xc   :  { %162 = vmatpush.msra.mxu1 %v807_v29  ;;  %v211_v54 = vmul.f32 64.0, %v655_v52  ;;  %vm215_vm8 = vweird.f32 %v655_v52  ;;  %v276_v14 = vld [vmem:[%s1031_s10] sm:$0xff]  ;;  %350 = vst.msk [vmem:[#allocation3 + $0x1f] sm:$0x1] %vm321_vm1, %v664_v3 }
   0xd   :  { %114 = vmatpush.msra.mxu0 %v90_v19 }
   0xe   :  { %163 = vmatpush.msra.mxu1 %v814_v30  ;;  %v212_v59 = vsub.f32 1.0, %v211_v54 }
   0xf   :  { %69 = vrot.lane.b32.xlu0 %v50_v15, %s666_s22  ;;  %115 = vmatpush.msra.mxu0 %v89_v20 }
  0x10   :  { %71 = vrot.lane.b32.xlu1 %v51_v17, %s666_s22  ;;  %164 = vmatpush.msra.mxu1 %v821_v31  ;;  %v213_v62 = vmul.f32 %v655_v52, %v212_v59 }
  0x11   :  { %116 = vmatpush.msra.mxu0 %v88_v21 }
  0x12   :  { %165 = vmatpush.msra.mxu1 %v828_v34  ;;  %v214_v5 = vadd.f32 %v655_v52, %v213_v62 }
  0x13   :  { %117 = vmatpush.msra.mxu0 %v87_v22 }
  0x14   :  { %166 = vmatpush.msra.mxu1 %v839_v39  ;;  %v870_v10 = vsel %vm215_vm8, %v655_v52, %v214_v5 }
  0x15   :  { %118 = vmatpush.msra.mxu0 %v86_v23 }
  0x16   :  { %167 = vmatpush.msra.mxu1 %v846_v40 }
  0x17   :  { %119 = vmatpush.msra.mxu0 %v85_v24 }
  0x18   :  { %295 = vmatpush.msrb.mxu1 %v276_v14 }
  0x19   :  { %120 = vmatpush.msra.mxu0 %v84_v25 }
  0x1b   :  { %121 = vmatpush.msra.mxu0 %v83_v26 }
  0x1d   :  { %465 = vmatpush.msrb.mxu0 %v795_v27 }
  0x1f   :  { %466 = vmatpush.msrb.mxu0 %v800_v28 }
  0x21   :  { %467 = vmatpush.msrb.mxu0 %v807_v29 }
  0x23   :  { %468 = vmatpush.msrb.mxu0 %v814_v30 }
  0x25   :  { %469 = vmatpush.msrb.mxu0 %v821_v31 }
  0x27   :  { %470 = vmatpush.msrb.mxu0 %v828_v34 }
  0x29   :  { %471 = vmatpush.msrb.mxu0 %v839_v39 }
  0x2b   :  { %472 = vmatpush.msrb.mxu0 %v846_v40 }
  0x79   :  { %v61_v32 = vpop.permute.xlu0 %60 }
  0x7a   :  { %67 = vst.msk [vmem:[#allocation2] sm:$0xff] %vm66_vm2, %v61_v32  ;;  %v63_v33 = vpop.permute.xlu1 %62 }
  0x7b   :  { %79 = vst.msk [vmem:[#allocation2 + $0x7] sm:$0x1] %vm78_vm3, %v664_v3 }
  0x7c   :  { %68 = vst.msk [vmem:[#allocation2 + $0x8] sm:$0xff] %vm66_vm2, %v63_v33  ;;  %vm346_vm2 = vcmask 522240  }
  0x7d   :  { %80 = vst.msk [vmem:[#allocation2 + $0xf] sm:$0x1] %vm78_vm3, %v664_v3  ;;  %v370_v3 = vld [vmem:[%s1032_s5 + $0x78] sm:$0xff]  ;;  %vm330_vm3 = vcmask 523265  }
  0x7e   :  { %389 = vmatpush.msra.mxu3 %v370_v3 }
  0x81   :  { %v70_v35 = vpop.permute.xlu0 %69 }
  0x82   :  { %76 = vst.msk [vmem:[#allocation2 - $0x1] sm:$0xfe] %vm75_vm4, %v70_v35  ;;  %v72_v36 = vpop.permute.xlu1 %71 }
  0x83   :  { %77 = vst.msk [vmem:[#allocation2 + $0x7] sm:$0xfe] %vm75_vm4, %v72_v36  ;;  %vm339_vm4 = vcmask 1048064  }
  0x89   :  { %v81_v37 = vld [vmem:[#allocation2] sm:$0xff] }
  0x8a   :  { %622 = vmatmul.msk.f32.vlgmr.msra.gmra.mxu0 %vm99_vm5, %v81_v37  ;;  %v82_v38 = vld [vmem:[#allocation2 + $0x8] sm:$0xff] }
  0x8b   :  { %590 = vmatpush.msra.mxu0 %v276_v14  ;;  %v374_v14 = vld [vmem:[%s1032_s5 + $0x98] sm:$0xff] }
  0x92   :  { %623 = vmatmul.msk.f32.gmra.mxu0 %vm99_vm5, %v82_v38 }
 0x107   :  { %v123_v42 = vpop.f32.mrf.mxu0 }
 0x108   :  { %v853_v43 = vadd.f32 %v648_v41, %v123_v42 }
 0x10a   :  { %624 = vmatmul.msk.f32.vlgmr.msra.gmra.mxu1 %vm139_vm6, %v853_v43  ;;  %v129_v46 = vmul.f32 %v853_v43, %v853_v43 }
 0x10f   :  { %v126_v44 = vpop.f32.mrf.mxu0 }
 0x110   :  { %v857_v45 = vadd.f32 %v648_v41, %v126_v44 }
 0x112   :  { %625 = vmatmul.msk.f32.gmra.mxu1 %vm139_vm6, %v857_v45  ;;  %v130_v47 = vmul.f32 %v857_v45, %v857_v45 }
 0x11a   :  { %626 = vmatmul.msk.f32.gmra.mxu1 %vm139_vm6, %v129_v46 }
 0x122   :  { %627 = vmatmul.msk.f32.gmra.mxu1 %vm139_vm6, %v130_v47 }
 0x187   :  { %v169_v49 = vpop.f32.mrf.mxu1 }
 0x188   :  { %v182_v50 = vsel %vm181_vm7, %v169_v49, 0.0 }
 0x189   :  { %v183_v51 = vrot.slane %v182_v50, 4 }
 0x18b   :  { %v184_v53 = vadd.f32 %v183_v51, %v182_v50 }
 0x18d   :  { %v185_v57 = vrot.slane %v184_v53, 2 }
 0x18f   :  { %v172_v55 = vpop.f32.mrf.mxu1  ;;  %v186_v60 = vadd.f32 %v185_v57, %v184_v53 }
 0x190   :  { %v189_v56 = vsel %vm181_vm7, %v172_v55, 0.0 }
 0x191   :  { %v190_v58 = vrot.slane %v189_v56, 4  ;;  %v187_v1 = vrot.slane %v186_v60, 1 }
 0x193   :  { %v191_v61 = vadd.f32 %v190_v58, %v189_v56  ;;  %v188_v7 = vadd.f32 %v187_v1, %v186_v60  ;;  %v649_v56 = vld [vmem:[%s1029_s3] ss:$0 sm:$0xff] }
 0x195   :  { %v192_v2 = vrot.slane %v191_v61, 2  ;;  %v217_v15 = vmul.f32 %v870_v10, %v188_v7 }
 0x197   :  { %v175_v63 = vpop.f32.mrf.mxu1  ;;  %v193_v8 = vadd.f32 %v192_v2, %v191_v61  ;;  %v221_v21 = vmul.f32 %v217_v15, %v217_v15 }
 0x198   :  { %v196_v0 = vsel %vm181_vm7, %v175_v63, 0.0  ;;  %v650_v63 = vld [vmem:[%s1030_s4] ss:$0 sm:$0xff] }
 0x199   :  { %v197_v4 = vrot.slane %v196_v0, 4  ;;  %v194_v16 = vrot.slane %v193_v8, 1 }
 0x19b   :  { %v198_v6 = vadd.f32 %v197_v4, %v196_v0  ;;  %v195_v22 = vadd.f32 %v194_v16, %v193_v8  ;;  %v372_v16 = vld [vmem:[%s1032_s5 + $0x88] sm:$0xff] }
 0x19d   :  { %v199_v9 = vrot.slane %v198_v6, 2  ;;  %v218_v32 = vmul.f32 %v870_v10, %v195_v22 }
 0x19f   :  { %v200_v11 = vadd.f32 %v199_v9, %v198_v6  ;;  %v178_v12 = vpop.f32.mrf.mxu1  ;;  %v222_v37 = vmul.f32 %v218_v32, %v218_v32  ;;  %v378_v9 = vld [vmem:[%s1032_s5 + $0xb8] sm:$0xff] }
 0x1a0   :  { %v203_v13 = vsel %vm181_vm7, %v178_v12, 0.0  ;;  %420 = vmatpush.msra.mxu2 %v378_v9  ;;  %v376_v12 = vld [vmem:[%s1032_s5 + $0xa8] sm:$0xff] }
 0x1a1   :  { %v201_v17 = vrot.slane %v200_v11, 1  ;;  %v204_v18 = vrot.slane %v203_v13, 4 }
 0x1a3   :  { %v202_v19 = vadd.f32 %v201_v17, %v200_v11  ;;  %v205_v20 = vadd.f32 %v204_v18, %v203_v13  ;;  %v377_v11 = vld [vmem:[%s1032_s5 + $0xb0] sm:$0xff]  ;;  %v375_v13 = vld [vmem:[%s1032_s5 + $0xa0] sm:$0xff] }
 0x1a4   :  { %421 = vmatpush.msra.mxu2 %v377_v11  ;;  %v371_v17 = vld [vmem:[%s1032_s5 + $0x80] sm:$0xff] }
 0x1a5   :  { %v219_v23 = vmul.f32 %v870_v10, %v202_v19  ;;  %v206_v24 = vrot.slane %v205_v20, 2 }
 0x1a6   :  { %422 = vmatpush.msra.mxu2 %v376_v12 }
 0x1a7   :  { %v223_v25 = vsub.f32 %v219_v23, %v221_v21  ;;  %v207_v26 = vadd.f32 %v206_v24, %v205_v20  ;;  %v369_v20 = vld [vmem:[%s1032_s5 + $0x70] sm:$0xff] }
 0x1a8   :  { %423 = vmatpush.msra.mxu2 %v375_v13  ;;  %390 = vmatpush.msra.mxu3 %v369_v20 }
 0x1a9   :  { %v225_v33 = vadd.f32 1e-05, %v223_v25  ;;  %v208_v35 = vrot.slane %v207_v26, 1 }
 0x1aa   :  { %424 = vmatpush.msra.mxu2 %v374_v14 }
 0x1ab   :  { %656 = vrsqrt.f32 %v225_v33  ;;  %v209_v36 = vadd.f32 %v208_v35, %v207_v26  ;;  %vm233_vm10 = vweird.f32 %v225_v33 }
 0x1ad   :  { %v220_v38 = vmul.f32 %v870_v10, %v209_v36 }
 0x1af   :  { %v224_v41 = vsub.f32 %v220_v38, %v222_v37  ;;  %v362_v38 = vld [vmem:[%s1032_s5 + $0x38] sm:$0xff] }
 0x1b1   :  { %v657_v42 = vpop.eup %656  ;;  %v226_v44 = vadd.f32 1e-05, %v224_v41 }
 0x1b2   :  { %v228_v46 = vmul.f32 %v657_v42, %v225_v33  ;;  %vm234_vm9 = vweird.f32 %v657_v42 }
 0x1b3   :  { %658 = vrsqrt.f32 %v226_v44  ;;  %vm235_vm12 = vmor %vm233_vm10, %vm234_vm9  ;;  %vm243_vm13 = vweird.f32 %v226_v44 }
 0x1b4   :  { %v229_v47 = vmul.f32 %v657_v42, %v228_v46  ;;  %v359_v46 = vld [vmem:[%s1032_s5 + $0x20] sm:$0xff] }
 0x1b6   :  { %v230_v48 = vmul.f32 0.5, %v229_v47 }
 0x1b8   :  { %v231_v50 = vsub.f32 1.5, %v230_v48 }
 0x1b9   :  { %v659_v49 = vpop.eup %658 }
 0x1ba   :  { %v238_v51 = vmul.f32 %v659_v49, %v226_v44  ;;  %v232_v54 = vmul.f32 %v657_v42, %v231_v50  ;;  %vm244_vm11 = vweird.f32 %v659_v49  ;;  %v360_v44 = vld [vmem:[%s1032_s5 + $0x28] sm:$0xff]  ;;  %v357_v50 = vld [vmem:[%s1032_s5 + $0x10] sm:$0xff] }
 0x1bb   :  { %vm245_vm14 = vmor %vm243_vm13, %vm244_vm11 }
 0x1bc   :  { %v239_v52 = vmul.f32 %v659_v49, %v238_v51  ;;  %v236_v57 = vsel %vm235_vm12, %v657_v42, %v232_v54  ;;  %v361_v42 = vld [vmem:[%s1032_s5 + $0x30] sm:$0xff]  ;;  %v356_v51 = vld [vmem:[%s1032_s5 + $0x8] sm:$0xff] }
 0x1bd   :  { %v251_v60 = vmul.f32 %v649_v56, %v236_v57  ;;  %v651_v57 = vld [vmem:[%s1033_s6] ss:$0 sm:$0xff] }
 0x1be   :  { %v240_v53 = vmul.f32 0.5, %v239_v52  ;;  %v355_v52 = vld [vmem:[%s1032_s5] sm:$0xff] }
 0x1bf   :  { %v254_v0 = vmul.f32 %v251_v60, %v217_v15  ;;  %v373_v15 = vld [vmem:[%s1032_s5 + $0x90] sm:$0xff] }
 0x1c0   :  { %v241_v55 = vsub.f32 1.5, %v240_v53  ;;  %425 = vmatpush.msra.mxu2 %v373_v15 }
 0x1c2   :  { %v242_v58 = vmul.f32 %v659_v49, %v241_v55  ;;  %426 = vmatpush.msra.mxu2 %v372_v16 }
 0x1c4   :  { %v246_v59 = vsel %vm245_vm14, %v659_v49, %v242_v58  ;;  %427 = vmatpush.msra.mxu2 %v371_v17  ;;  %v358_v49 = vld [vmem:[%s1032_s5 + $0x18] sm:$0xff] }
 0x1c5   :  { %v252_v61 = vmul.f32 %v649_v56, %v246_v59 }
 0x1c6   :  { %636 = vmatpush.msrb.mxu2 %v795_v27  ;;  %v368_v27 = vld [vmem:[%s1032_s5 + $0x68] sm:$0xff] }
 0x1c7   :  { %v255_v62 = vmul.f32 %v252_v61, %v218_v32  ;;  %v268_v4 = vrot.slane %v252_v61, 7  ;;  %391 = vmatpush.msra.mxu3 %v368_v27 }
 0x1c8   :  { %637 = vmatpush.msrb.mxu2 %v800_v28 }
 0x1c9   :  { %v261_v1 = vrot.slane %v255_v62, 7  ;;  %v269_v7 = vsel %vm262_vm15, %v268_v4, %v251_v60 }
 0x1ca   :  { %638 = vmatpush.msrb.mxu2 %v807_v29 }
 0x1cb   :  { %v263_v2 = vsel %vm262_vm15, %v261_v1, %v254_v0 }
 0x1cc   :  { %v265_v5 = vsub.f32 %v650_v63, %v263_v2  ;;  %639 = vmatpush.msrb.mxu2 %v814_v30  ;;  %v367_v30 = vld [vmem:[%s1032_s5 + $0x60] sm:$0xff] }
 0x1cd   :  { %392 = vmatpush.msra.mxu3 %v367_v30 }
 0x1ce   :  { %v272_v6 = vrot.slane %v265_v5, 6  ;;  %640 = vmatpush.msrb.mxu2 %v821_v31  ;;  %v366_v31 = vld [vmem:[%s1032_s5 + $0x58] sm:$0xff] }
 0x1cf   :  { %393 = vmatpush.msra.mxu3 %v366_v31 }
 0x1d0   :  { %v275_v8 = vsel %vm274_vm0, %v269_v7, %v272_v6  ;;  %641 = vmatpush.msrb.mxu2 %v828_v34 }
 0x1d1   :  { %628 = vmatmul.msk.f32.vlgmr.msrb.gmra.mxu1 %vm181_vm7, %v275_v8 }
 0x1d2   :  { %642 = vmatpush.msrb.mxu2 %v839_v39  ;;  %v365_v39 = vld [vmem:[%s1032_s5 + $0x50] sm:$0xff] }
 0x1d3   :  { %394 = vmatpush.msra.mxu3 %v365_v39 }
 0x1d4   :  { %643 = vmatpush.msrb.mxu2 %v846_v40  ;;  %v364_v40 = vld [vmem:[%s1032_s5 + $0x48] sm:$0xff] }
 0x1d5   :  { %395 = vmatpush.msra.mxu3 %v364_v40 }
 0x24e   :  { %v297_v18 = vpop.f32.mrf.mxu1 }
 0x24f   :  { %v301_v19 = vrot.slane %v297_v18, 1  ;;  %308 = vst [vmem:[#allocation1] sm:$0xff] %v297_v18  ;;  %v302_v28 = vperm.slane %v297_v18, 0 }
 0x251   :  { %v303_v29 = vperm.slane %v301_v19, 0  ;;  %v306_v34 = vmul.f32 %v302_v28, %v853_v43  ;;  %v363_v43 = vld [vmem:[%s1032_s5 + $0x40] sm:$0xff] }
 0x252   :  { %396 = vmatpush.msra.mxu3 %v363_v43 }
 0x253   :  { %v307_v23 = vmul.f32 %v303_v29, %v857_v45 }
 0x254   :  { %397 = vmatpush.msra.mxu3 %v362_v38 }
 0x256   :  { %v310_v21 = vld [vmem:[#allocation1 + $0x2] ss:$9 sm:$0xff]  ;;  %398 = vmatpush.msra.mxu3 %v361_v42 }
 0x257   :  { %v312_v22 = vld [vmem:[#allocation1 + $0x3] ss:$9 sm:$0xff]  ;;  %v313_v24 = vperm.slane %v310_v21, 0 }
 0x258   :  { %v314_v25 = vperm.slane %v312_v22, 0  ;;  %399 = vmatpush.msra.mxu3 %v360_v44 }
 0x259   :  { %v317_v26 = vadd.f32 %v313_v24, %v306_v34 }
 0x25a   :  { %v318_v32 = vadd.f32 %v314_v25, %v307_v23  ;;  %400 = vmatpush.msra.mxu3 %v359_v46 }
 0x25b   :  { %v319_v33 = vmax.f32 %v317_v26, 0.0 }
 0x25c   :  { %v320_v35 = vmax.f32 %v318_v32, 0.0  ;;  %401 = vmatpush.msra.mxu3 %v358_v49 }
 0x25d   :  { %333 = vrot.lane.b32.xlu2 %v319_v33, %s666_s22  ;;  %v326_v45 = vrot.slane %v319_v33, 7  ;;  %v342_v36 = vrot.slane %v319_v33, 1 }
 0x25e   :  { %v343_v37 = vrot.slane %v320_v35, 1  ;;  %v327_v41 = vrot.slane %v320_v35, 7  ;;  %402 = vmatpush.msra.mxu3 %v357_v50 }
 0x25f   :  { %347 = vst.msk [vmem:[#allocation3 + $0x8] sm:$0x7f] %vm346_vm2, %v342_v36 }
 0x260   :  { %348 = vst.msk [vmem:[#allocation3 + $0x18] sm:$0x7f] %vm346_vm2, %v343_v37  ;;  %403 = vmatpush.msra.mxu3 %v356_v51 }
 0x261   :  { %331 = vst.msk [vmem:[#allocation3] sm:$0xfe] %vm330_vm3, %v326_v45 }
 0x262   :  { %332 = vst.msk [vmem:[#allocation3 + $0x10] sm:$0xfe] %vm330_vm3, %v327_v41  ;;  %404 = vmatpush.msra.mxu3 %v355_v52 }
 0x265   :  { %335 = vrot.lane.b32.xlu2 %v320_v35, %s666_s22 }
 0x266   :  { %v352_v47 = vld [vmem:[#allocation3 + $0x8] sm:$0xff] }
 0x267   :  { %629 = vmatmul.msk.f32.vlgmr.msra.gmra.mxu2 %vm139_vm6, %v352_v47  ;;  %v354_v48 = vld [vmem:[#allocation3 + $0x18] sm:$0xff] }
 0x26f   :  { %630 = vmatmul.msk.f32.gmra.mxu2 %vm139_vm6, %v354_v48 }
 0x2b7   :  { %v334_v53 = vpop.permute.xlu2 %333 }
 0x2b8   :  { %340 = vst.msk [vmem:[#allocation3] sm:$0xff] %vm339_vm4, %v334_v53 }
 0x2bf   :  { %v336_v54 = vpop.permute.xlu2 %335  ;;  %v351_v55 = vld [vmem:[#allocation3] sm:$0xff] }
 0x2c0   :  { %341 = vst.msk [vmem:[#allocation3 + $0x10] sm:$0xff] %vm339_vm4, %v336_v54  ;;  %405 = vmatmul.f32.vlgmr.msra.gmra.mxu3 %v351_v55 }
 0x2c7   :  { %v353_v56 = vld [vmem:[#allocation3 + $0x10] sm:$0xff] }
 0x2c8   :  { %408 = vmatmul.f32.gmra.mxu3 %v353_v56 }
 0x2ea   :  { %v429_v58 = vpop.f32.mrf.mxu2 }
 0x2f2   :  { %v432_v0 = vpop.f32.mrf.mxu2 }
 0x343   :  { %v406_v59 = vpop.f32.mrf.mxu3 }
 0x344   :  { %v407_v60 = vadd.f32 %v651_v57, %v406_v59 }
 0x346   :  { %v983_v61 = vadd.f32 %v429_v58, %v407_v60 }
 0x348   :  { %631 = vmatmul.msk.f32.vlgmr.msrb.gmra.mxu0 %vm139_vm6, %v983_v61  ;;  %v435_v2 = vmul.f32 %v983_v61, %v983_v61 }
 0x34b   :  { %v409_v62 = vpop.f32.mrf.mxu3 }
 0x34c   :  { %v410_v63 = vadd.f32 %v651_v57, %v409_v62 }
 0x34e   :  { %v987_v1 = vadd.f32 %v432_v0, %v410_v63 }
 0x350   :  { %632 = vmatmul.msk.f32.vlgmr.msrb.gmra.mxu2 %vm139_vm6, %v987_v1  ;;  %v436_v4 = vmul.f32 %v987_v1, %v987_v1 }
 0x358   :  { %633 = vmatmul.msk.f32.gmra.mxu2 %vm139_vm6, %v435_v2  ;;  %v653_v2 = vld [vmem:[%s1035_s8] ss:$0 sm:$0xff] }
 0x360   :  { %634 = vmatmul.msk.f32.gmra.mxu2 %vm139_vm6, %v436_v4 }
 0x3c5   :  { %v474_v5 = vpop.f32.mrf.mxu0 }
 0x3c6   :  { %v486_v6 = vsel %vm181_vm7, %v474_v5, 0.0 }
 0x3c7   :  { %v487_v7 = vrot.slane %v486_v6, 4 }
 0x3c9   :  { %v488_v8 = vadd.f32 %v487_v7, %v486_v6 }
 0x3cb   :  { %v489_v12 = vrot.slane %v488_v8, 2 }
 0x3cd   :  { %v490_v14 = vadd.f32 %v489_v12, %v488_v8 }
 0x3cf   :  { %v491_v18 = vrot.slane %v490_v14, 1 }
 0x3d1   :  { %v492_v27 = vadd.f32 %v491_v18, %v490_v14 }
 0x3d3   :  { %v477_v9 = vpop.f32.mrf.mxu2  ;;  %v514_v22 = vmul.f32 %v492_v27, %v870_v10 }
 0x3d4   :  { %v493_v11 = vsel %vm181_vm7, %v477_v9, 0.0 }
 0x3d5   :  { %v494_v13 = vrot.slane %v493_v11, 4  ;;  %v518_v26 = vmul.f32 %v514_v22, %v514_v22 }
 0x3d7   :  { %v495_v15 = vadd.f32 %v494_v13, %v493_v11 }
 0x3d9   :  { %v496_v19 = vrot.slane %v495_v15, 2 }
 0x3db   :  { %v480_v16 = vpop.f32.mrf.mxu2  ;;  %v497_v28 = vadd.f32 %v496_v19, %v495_v15 }
 0x3dc   :  { %v500_v17 = vsel %vm181_vm7, %v480_v16, 0.0 }
 0x3dd   :  { %v501_v3 = vrot.slane %v500_v17, 4  ;;  %v498_v34 = vrot.slane %v497_v28, 1 }
 0x3df   :  { %v502_v20 = vadd.f32 %v501_v3, %v500_v17  ;;  %v499_v32 = vadd.f32 %v498_v34, %v497_v28 }
 0x3e1   :  { %v503_v29 = vrot.slane %v502_v20, 2  ;;  %v515_v45 = vmul.f32 %v499_v32, %v870_v10 }
 0x3e3   :  { %v504_v30 = vadd.f32 %v503_v29, %v502_v20  ;;  %v483_v31 = vpop.f32.mrf.mxu2  ;;  %v519_v41 = vmul.f32 %v515_v45, %v515_v45 }
 0x3e4   :  { %v507_v21 = vsel %vm181_vm7, %v483_v31, 0.0 }
 0x3e5   :  { %v505_v23 = vrot.slane %v504_v30, 1  ;;  %v508_v24 = vrot.slane %v507_v21, 4 }
 0x3e7   :  { %v506_v25 = vadd.f32 %v505_v23, %v504_v30  ;;  %v509_v39 = vadd.f32 %v508_v24, %v507_v21 }
 0x3e9   :  { %v516_v40 = vmul.f32 %v506_v25, %v870_v10  ;;  %v510_v33 = vrot.slane %v509_v39, 2 }
 0x3eb   :  { %v520_v35 = vsub.f32 %v516_v40, %v518_v26  ;;  %v511_v43 = vadd.f32 %v510_v33, %v509_v39 }
 0x3ed   :  { %v522_v36 = vadd.f32 1e-05, %v520_v35  ;;  %v512_v37 = vrot.slane %v511_v43, 1 }
 0x3ef   :  { %660 = vrsqrt.f32 %v522_v36  ;;  %v513_v38 = vadd.f32 %v512_v37, %v511_v43  ;;  %vm530_vm8 = vweird.f32 %v522_v36 }
 0x3f1   :  { %v517_v42 = vmul.f32 %v513_v38, %v870_v10  ;;  %v652_v10 = vld [vmem:[%s1034_s7] ss:$0 sm:$0xff] }
 0x3f3   :  { %v521_v44 = vsub.f32 %v517_v42, %v519_v41 }
 0x3f5   :  { %v661_v46 = vpop.eup %660  ;;  %v523_v47 = vadd.f32 1e-05, %v521_v44 }
 0x3f6   :  { %v525_v48 = vmul.f32 %v661_v46, %v522_v36  ;;  %vm531_vm5 = vweird.f32 %v661_v46 }
 0x3f7   :  { %662 = vrsqrt.f32 %v523_v47  ;;  %vm532_vm10 = vmor %vm530_vm8, %vm531_vm5  ;;  %vm540_vm11 = vweird.f32 %v523_v47 }
 0x3f8   :  { %v526_v49 = vmul.f32 %v661_v46, %v525_v48 }
 0x3fa   :  { %v527_v50 = vmul.f32 0.5, %v526_v49 }
 0x3fc   :  { %v528_v52 = vsub.f32 1.5, %v527_v50 }
 0x3fd   :  { %v663_v51 = vpop.eup %662 }
 0x3fe   :  { %v535_v53 = vmul.f32 %v663_v51, %v523_v47  ;;  %v529_v56 = vmul.f32 %v661_v46, %v528_v52  ;;  %vm541_vm9 = vweird.f32 %v663_v51 }
 0x3ff   :  { %vm542_vm12 = vmor %vm540_vm11, %vm541_vm9 }
 0x400   :  { %v536_v54 = vmul.f32 %v663_v51, %v535_v53  ;;  %v533_v59 = vsel %vm532_vm10, %v661_v46, %v529_v56 }
 0x401   :  { %v548_v62 = vmul.f32 %v652_v10, %v533_v59 }
 0x402   :  { %v537_v55 = vmul.f32 0.5, %v536_v54 }
 0x403   :  { %v551_v4 = vmul.f32 %v548_v62, %v514_v22 }
 0x404   :  { %v538_v57 = vsub.f32 1.5, %v537_v55 }
 0x406   :  { %v539_v58 = vmul.f32 %v663_v51, %v538_v57 }
 0x408   :  { %v543_v60 = vsel %vm542_vm12, %v663_v51, %v539_v58 }
 0x409   :  { %v549_v63 = vmul.f32 %v652_v10, %v543_v60 }
 0x40b   :  { %v552_v0 = vmul.f32 %v549_v63, %v515_v45  ;;  %v564_v7 = vrot.slane %v549_v63, 7 }
 0x40d   :  { %v558_v5 = vrot.slane %v552_v0, 7  ;;  %v565_v11 = vsel %vm262_vm15, %v564_v7, %v548_v62 }
 0x40f   :  { %v559_v6 = vsel %vm262_vm15, %v558_v5, %v551_v4 }
 0x410   :  { %v561_v8 = vsub.f32 %v653_v2, %v559_v6 }
 0x412   :  { %v568_v9 = vrot.slane %v561_v8, 6 }
 0x414   :  { %v570_v12 = vsel %vm274_vm0, %v565_v11, %v568_v9 }
 0x415   :  { %635 = vmatmul.msk.f32.vlgmr.msra.gmra.mxu0 %vm181_vm7, %v570_v12 }
 0x492   :  { %v592_v13 = vpop.f32.mrf.mxu0 }
 0x493   :  { %v596_v14 = vrot.slane %v592_v13, 1  ;;  %603 = vst [vmem:[#allocation1] sm:$0xff] %v592_v13  ;;  %v597_v15 = vperm.slane %v592_v13, 0 }
 0x495   :  { %v598_v16 = vperm.slane %v596_v14, 0  ;;  %v601_v19 = vmul.f32 %v597_v15, %v983_v61 }
 0x497   :  { %v602_v3 = vmul.f32 %v598_v16, %v987_v1 }
 0x49a   :  { %v605_v17 = vld [vmem:[#allocation1 + $0x2] ss:$9 sm:$0xff] }
 0x49b   :  { %v607_v18 = vld [vmem:[#allocation1 + $0x3] ss:$9 sm:$0xff]  ;;  %v608_v20 = vperm.slane %v605_v17, 0 }
 0x49c   :  { %v609_v27 = vperm.slane %v607_v18, 0 }
 0x49d   :  { %v612_v28 = vadd.f32 %v608_v20, %v601_v19 }
 0x49e   :  { %v613_v29 = vadd.f32 %v609_v27, %v602_v3 }
 0x49f   :  { %v614_v30 = vmax.f32 %v612_v28, 0.0 }
 0x4a0   :  { %v615_v31 = vmax.f32 %v613_v29, 0.0 }
 0x4a1   :  { %616 = vst.msk [vmem:[%s1036_s11] sm:$0xff] %vm139_vm6, %v614_v30 }
 0x4a2   :  { %617 = vst.msk [vmem:[%s1036_s11 + $0x8] sm:$0xff] %vm139_vm6, %v615_v31 }

</bundles_post_ra>
